<compile_context>
chip_gen: v5e
topology: v5e:2x2
jax: 0.10.0
libtpu: 0.0.40
codegen_flags: <defaults>
</compile_context>

<pallas_src>
import jax
import jax.numpy as jnp
from jax.experimental import pallas as pl
from jax.experimental.pallas import tpu as pltpu


def _make_deepsets_kernel(n_phi_layers: int, n_rho_layers: int):
    """Build a kernel closed over the (static) layer counts."""
    n_layers = n_phi_layers + n_rho_layers

    def kernel(*refs):
        feat_ref = refs[0]                       # (Bt, N, D) block
        param_refs = refs[1:1 + 2 * n_layers]    # alternating (W, b) refs
        out_ref = refs[1 + 2 * n_layers]         # (Bt, D) block

        bt, n_elec, d = feat_ref.shape

        # Flatten the per-step batch so phi runs as one wide matmul per layer.
        # Minor dim D is unchanged and N is sublane-aligned, so this reshape
        # does not materialize a relayout copy.
        x = feat_ref[...].reshape(bt * n_elec, d).astype(jnp.float32)

        idx = 0
        # phi: per-electrode MLP, each layer is Linear + ReLU.
        for _ in range(n_phi_layers):
            w = param_refs[idx][...]
            b = param_refs[idx + 1][...]
            idx += 2
            x = jnp.maximum(
                jnp.dot(x, w, preferred_element_type=jnp.float32) + b, 0.0)

        # DeepSets permutation-invariant pooling: sum over the N electrodes.
        h = x.shape[-1]
        pooled = jnp.sum(x.reshape(bt, n_elec, h), axis=1)   # (Bt, H)

        # rho: MLP on the pooled vectors (torch module ends with Linear + ReLU).
        y = pooled
        for _ in range(n_rho_layers):
            w = param_refs[idx][...]
            b = param_refs[idx + 1][...]
            idx += 2
            y = jnp.maximum(
                jnp.dot(y, w, preferred_element_type=jnp.float32) + b, 0.0)

        out_ref[...] = y.astype(out_ref.dtype)   # (Bt, D)

    return kernel


def deepsets_context_encoder(features, phi_params, rho_params, *,
                             block_batch=None):
    """features: (B, N, D) f32; *_params: list of (W(in,out), b(1,out))."""
    B, N, D = features.shape
    n_phi = len(phi_params)
    n_rho = len(rho_params)
    H = phi_params[0][0].shape[1]

    flat_params = []
    for (w, b) in list(phi_params) + list(rho_params):
        flat_params.append(w)
        flat_params.append(b)

    # Pick a batch tile so Bt*N rows feed the MXU well (~256 rows for the
    # 2x256^2 v6e/v7x MXU; >=128 is enough on v5e). Clamp to the batch size.
    if block_batch is None:
        block_batch = max(1, 256 // max(N, 1))
    Bt = max(1, min(block_batch, B))

    # Pad B up to a multiple of Bt; padded samples are discarded afterwards
    # (pooling is per-sample, so padding never contaminates real samples).
    n_steps = pl.cdiv(B, Bt)
    B_pad = n_steps * Bt
    if B_pad != B:
        features = jnp.pad(features, ((0, B_pad - B), (0, 0), (0, 0)))

    kernel = _make_deepsets_kernel(n_phi, n_rho)

    in_specs = [pl.BlockSpec((Bt, N, D), lambda i: (i, 0, 0))]
    for p in flat_params:
        # Weights/biases: full-array VMEM blocks, same for every grid step
        # (constant index_map keeps them resident). Note the default-arg bind
        # of the rank to avoid late-binding bugs in the loop.
        in_specs.append(
            pl.BlockSpec(p.shape, lambda i, _nd=p.ndim: (0,) * _nd))

    out_spec = pl.BlockSpec((Bt, D), lambda i: (i, 0))

    # --- Cost estimate (advisory for XLA's scheduler). ---
    flops = 0
    for (w, _b) in phi_params:
        flops += 2 * B_pad * N * w.shape[0] * w.shape[1]
    for (w, _b) in rho_params:
        flops += 2 * B_pad * w.shape[0] * w.shape[1]
    param_bytes = sum(int(p.size) * p.dtype.itemsize for p in flat_params)
    bytes_accessed = (int(features.size) * features.dtype.itemsize
                      + param_bytes + B_pad * D * 4)
    cost = pl.CostEstimate(flops=int(flops), transcendentals=0,
                           bytes_accessed=int(bytes_accessed))

    # --- Explicit VMEM budget (keeps v7x's 64 MiB per-TC VMEM safe). ---
    feat_buf = 2 * Bt * N * D * 4                   # double-buffered input tile
    out_buf = 2 * Bt * D * 4                        # double-buffered output tile
    weight_buf = 2 * param_bytes                    # default double-buffering
    act_buf = 4 * Bt * N * max(D, H, 128) * 4       # lane-padded live activations
    vmem_limit = int(min(max(4 * (feat_buf + out_buf + weight_buf + act_buf),
                             8 << 20), 48 << 20))

    out = pl.pallas_call(
        kernel,
        out_shape=jax.ShapeDtypeStruct((B_pad, D), jnp.float32),
        grid_spec=pltpu.PrefetchScalarGridSpec(
            num_scalar_prefetch=0,
            grid=(n_steps,),
            in_specs=in_specs,
            out_specs=out_spec,
        ),
        compiler_params=pltpu.CompilerParams(
            dimension_semantics=("parallel",),
            vmem_limit_bytes=vmem_limit),
        cost_estimate=cost,
    )(features, *flat_params)

    return out[:B]


def _init_linear(key, fan_in, fan_out):
    """Deterministic init (torch-style uniform bound), W stored as (in, out)."""
    kw, kb = jax.random.split(key)
    bound = 1.0 / jnp.sqrt(float(fan_in))
    w = jax.random.uniform(kw, (fan_in, fan_out), jnp.float32, -bound, bound)
    b = jax.random.uniform(kb, (1, fan_out), jnp.float32, -bound, bound)
    return w, b


def build_params(key, feature_dim, hidden_dim, phi_num_layers, rho_num_layers):
    """Mirror DeepSetsContextEncoder.__init__ parameter shapes."""
    keys = jax.random.split(key, phi_num_layers + rho_num_layers)
    k = 0

    # phi: Linear(D, H) + ReLU, then (phi_num_layers - 1) x [Linear(H, H) + ReLU]
    phi = [_init_linear(keys[k], feature_dim, hidden_dim)]
    k += 1
    for _ in range(phi_num_layers - 1):
        phi.append(_init_linear(keys[k], hidden_dim, hidden_dim))
        k += 1

    # rho: (rho_num_layers - 1) x [Linear(H, H) + ReLU], then Linear(H, D) + ReLU
    rho = []
    for _ in range(rho_num_layers - 1):
        rho.append(_init_linear(keys[k], hidden_dim, hidden_dim))
        k += 1
    rho.append(_init_linear(keys[k], hidden_dim, feature_dim))
    return phi, rho


def reference_forward(features, phi_params, rho_params):
    """Pure-JAX reference matching the torch forward exactly."""
    B, N, D = features.shape
    x = features.reshape(B * N, D)
    for (w, b) in phi_params:
        x = jnp.maximum(x @ w + b, 0.0)
    H = x.shape[-1]
    pooled = x.reshape(B, N, H).sum(axis=1)
    y = pooled
    for (w, b) in rho_params:
        y = jnp.maximum(y @ w + b, 0.0)
    return y


if __name__ == "__main__":
    # Config consistent with the module's forward:
    #   N=8 electrodes, feature_dim D=16, hidden_dim H=32,
    #   phi.num_layers=2, rho.num_layers=2. B=32 with Bt=16 gives a 2-step
    #   parallel grid (both v7x TensorCores busy) and 128 MXU rows per step.
    B, N, D, H = 32, 8, 16, 32
    phi_num_layers, rho_num_layers = 2, 2

    key = jax.random.PRNGKey(0)
    k_feat, k_params = jax.random.split(key)

    features = jax.random.normal(k_feat, (B, N, D), dtype=jnp.float32)
    phi_params, rho_params = build_params(
        k_params, D, H, phi_num_layers, rho_num_layers)

    out = deepsets_context_encoder(features, phi_params, rho_params,
                                   block_batch=16)
    out = jax.block_until_ready(out)

    ref = reference_forward(features, phi_params, rho_params)
    assert out.shape == (B, D), out.shape
    assert jnp.allclose(out, ref, atol=1e-5, rtol=1e-5), (
        float(jnp.max(jnp.abs(out - ref))))

    print("KERNEL_OK")
</pallas_src>

<mosaic_0001>
module attributes {stable_mosaic.version = 11 : i64} {
  func.func @kernel(%arg0: i32, %arg1: memref<16x8x16xf32, #tpu.memory_space<vmem>>, %arg2: memref<16x32xf32, #tpu.memory_space<vmem>>, %arg3: memref<1x32xf32, #tpu.memory_space<vmem>>, %arg4: memref<32x32xf32, #tpu.memory_space<vmem>>, %arg5: memref<1x32xf32, #tpu.memory_space<vmem>>, %arg6: memref<32x32xf32, #tpu.memory_space<vmem>>, %arg7: memref<1x32xf32, #tpu.memory_space<vmem>>, %arg8: memref<32x16xf32, #tpu.memory_space<vmem>>, %arg9: memref<1x16xf32, #tpu.memory_space<vmem>>, %arg10: memref<16x16xf32, #tpu.memory_space<vmem>>) attributes {dimension_semantics = [#tpu.dimension_semantics<parallel>], iteration_bounds = array<i64: 2>, scalar_prefetch = 0 : i64, scratch_operands = 0 : i64, tpu.core_type = #tpu.core_type<tc>, window_params = [{transform_indices = @transform_0, window_bounds = array<i64: 16, 8, 16>}, {pipeline_mode = #tpu.pipeline_mode<synchronous>, transform_indices = @transform_1, window_bounds = array<i64: 16, 32>}, {pipeline_mode = #tpu.pipeline_mode<synchronous>, transform_indices = @transform_2, window_bounds = array<i64: 1, 32>}, {pipeline_mode = #tpu.pipeline_mode<synchronous>, transform_indices = @transform_3, window_bounds = array<i64: 32, 32>}, {pipeline_mode = #tpu.pipeline_mode<synchronous>, transform_indices = @transform_4, window_bounds = array<i64: 1, 32>}, {pipeline_mode = #tpu.pipeline_mode<synchronous>, transform_indices = @transform_5, window_bounds = array<i64: 32, 32>}, {pipeline_mode = #tpu.pipeline_mode<synchronous>, transform_indices = @transform_6, window_bounds = array<i64: 1, 32>}, {pipeline_mode = #tpu.pipeline_mode<synchronous>, transform_indices = @transform_7, window_bounds = array<i64: 32, 16>}, {pipeline_mode = #tpu.pipeline_mode<synchronous>, transform_indices = @transform_8, window_bounds = array<i64: 1, 16>}, {transform_indices = @transform_9, window_bounds = array<i64: 16, 16>}]} {
    %c0 = arith.constant 0 : index
    %c0_0 = arith.constant 0 : index
    %c0_1 = arith.constant 0 : index
    %0 = vector.load %arg1[%c0, %c0_0, %c0_1] : memref<16x8x16xf32, #tpu.memory_space<vmem>>, vector<16x8x16xf32>
    %1 = vector.shape_cast %0 : vector<16x8x16xf32> to vector<128x16xf32>
    %c0_2 = arith.constant 0 : index
    %c0_3 = arith.constant 0 : index
    %2 = vector.load %arg2[%c0_2, %c0_3] : memref<16x32xf32, #tpu.memory_space<vmem>>, vector<16x32xf32>
    %c0_4 = arith.constant 0 : index
    %c0_5 = arith.constant 0 : index
    %3 = vector.load %arg3[%c0_4, %c0_5] : memref<1x32xf32, #tpu.memory_space<vmem>>, vector<1x32xf32>
    %cst = arith.constant dense<0.000000e+00> : vector<128x32xf32>
    %4 = tpu.matmul %1, %2, %cst {dimension_numbers = #tpu.dot_dimension_numbers<[1], [0], [0], [1], [0, 0, 1, 1], [], []>} : vector<128x16xf32>, vector<16x32xf32>, vector<128x32xf32> -> vector<128x32xf32>
    %5 = vector.broadcast %3 : vector<1x32xf32> to vector<128x32xf32>
    %6 = arith.addf %4, %5 : vector<128x32xf32>
    %cst_6 = arith.constant 0.000000e+00 : f32
    %7 = vector.broadcast %cst_6 : f32 to vector<128x32xf32>
    %8 = arith.maximumf %6, %7 : vector<128x32xf32>
    %c0_7 = arith.constant 0 : index
    %c0_8 = arith.constant 0 : index
    %9 = vector.load %arg4[%c0_7, %c0_8] : memref<32x32xf32, #tpu.memory_space<vmem>>, vector<32x32xf32>
    %c0_9 = arith.constant 0 : index
    %c0_10 = arith.constant 0 : index
    %10 = vector.load %arg5[%c0_9, %c0_10] : memref<1x32xf32, #tpu.memory_space<vmem>>, vector<1x32xf32>
    %cst_11 = arith.constant dense<0.000000e+00> : vector<128x32xf32>
    %11 = tpu.matmul %8, %9, %cst_11 {dimension_numbers = #tpu.dot_dimension_numbers<[1], [0], [0], [1], [0, 0, 1, 1], [], []>} : vector<128x32xf32>, vector<32x32xf32>, vector<128x32xf32> -> vector<128x32xf32>
    %12 = vector.broadcast %10 : vector<1x32xf32> to vector<128x32xf32>
    %13 = arith.addf %11, %12 : vector<128x32xf32>
    %cst_12 = arith.constant 0.000000e+00 : f32
    %14 = vector.broadcast %cst_12 : f32 to vector<128x32xf32>
    %15 = arith.maximumf %13, %14 : vector<128x32xf32>
    %16 = vector.shape_cast %15 : vector<128x32xf32> to vector<16x8x32xf32>
    %cst_13 = arith.constant dense<0.000000e+00> : vector<16x32xf32>
    %17 = vector.multi_reduction <add>, %16, %cst_13 [1] : vector<16x8x32xf32> to vector<16x32xf32>
    %c0_14 = arith.constant 0 : index
    %c0_15 = arith.constant 0 : index
    %18 = vector.load %arg6[%c0_14, %c0_15] : memref<32x32xf32, #tpu.memory_space<vmem>>, vector<32x32xf32>
    %c0_16 = arith.constant 0 : index
    %c0_17 = arith.constant 0 : index
    %19 = vector.load %arg7[%c0_16, %c0_17] : memref<1x32xf32, #tpu.memory_space<vmem>>, vector<1x32xf32>
    %cst_18 = arith.constant dense<0.000000e+00> : vector<16x32xf32>
    %20 = tpu.matmul %17, %18, %cst_18 {dimension_numbers = #tpu.dot_dimension_numbers<[1], [0], [0], [1], [0, 0, 1, 1], [], []>} : vector<16x32xf32>, vector<32x32xf32>, vector<16x32xf32> -> vector<16x32xf32>
    %21 = vector.broadcast %19 : vector<1x32xf32> to vector<16x32xf32>
    %22 = arith.addf %20, %21 : vector<16x32xf32>
    %cst_19 = arith.constant 0.000000e+00 : f32
    %23 = vector.broadcast %cst_19 : f32 to vector<16x32xf32>
    %24 = arith.maximumf %22, %23 : vector<16x32xf32>
    %c0_20 = arith.constant 0 : index
    %c0_21 = arith.constant 0 : index
    %25 = vector.load %arg8[%c0_20, %c0_21] : memref<32x16xf32, #tpu.memory_space<vmem>>, vector<32x16xf32>
    %c0_22 = arith.constant 0 : index
    %c0_23 = arith.constant 0 : index
    %26 = vector.load %arg9[%c0_22, %c0_23] : memref<1x16xf32, #tpu.memory_space<vmem>>, vector<1x16xf32>
    %cst_24 = arith.constant dense<0.000000e+00> : vector<16x16xf32>
    %27 = tpu.matmul %24, %25, %cst_24 {dimension_numbers = #tpu.dot_dimension_numbers<[1], [0], [0], [1], [0, 0, 1, 1], [], []>} : vector<16x32xf32>, vector<32x16xf32>, vector<16x16xf32> -> vector<16x16xf32>
    %28 = vector.broadcast %26 : vector<1x16xf32> to vector<16x16xf32>
    %29 = arith.addf %27, %28 : vector<16x16xf32>
    %cst_25 = arith.constant 0.000000e+00 : f32
    %30 = vector.broadcast %cst_25 : f32 to vector<16x16xf32>
    %31 = arith.maximumf %29, %30 : vector<16x16xf32>
    %c0_26 = arith.constant 0 : index
    %c0_27 = arith.constant 0 : index
    %32 = vector.load %arg10[%c0_26, %c0_27] : memref<16x16xf32, #tpu.memory_space<vmem>>, vector<16x16xf32>
    tpu.vector_store %arg10[%c0_26, %c0_27], %31 {strides = array<i32>} : memref<16x16xf32, #tpu.memory_space<vmem>>, vector<16x16xf32>,
    return
  }
  func.func @transform_0(%arg0: i32) -> (i32, i32, i32) {
    %c0_i32 = arith.constant 0 : i32
    %c0_i32_0 = arith.constant 0 : i32
    %c0_i32_1 = arith.constant 0 : i32
    return %arg0, %c0_i32, %c0_i32_0 : i32, i32, i32
  }
  func.func @transform_1(%arg0: i32) -> (i32, i32) {
    %c0_i32 = arith.constant 0 : i32
    %c0_i32_0 = arith.constant 0 : i32
    %c0_i32_1 = arith.constant 0 : i32
    return %c0_i32, %c0_i32_0 : i32, i32
  }
  func.func @transform_2(%arg0: i32) -> (i32, i32) {
    %c0_i32 = arith.constant 0 : i32
    %c0_i32_0 = arith.constant 0 : i32
    %c0_i32_1 = arith.constant 0 : i32
    return %c0_i32, %c0_i32_0 : i32, i32
  }
  func.func @transform_3(%arg0: i32) -> (i32, i32) {
    %c0_i32 = arith.constant 0 : i32
    %c0_i32_0 = arith.constant 0 : i32
    %c0_i32_1 = arith.constant 0 : i32
    return %c0_i32, %c0_i32_0 : i32, i32
  }
  func.func @transform_4(%arg0: i32) -> (i32, i32) {
    %c0_i32 = arith.constant 0 : i32
    %c0_i32_0 = arith.constant 0 : i32
    %c0_i32_1 = arith.constant 0 : i32
    return %c0_i32, %c0_i32_0 : i32, i32
  }
  func.func @transform_5(%arg0: i32) -> (i32, i32) {
    %c0_i32 = arith.constant 0 : i32
    %c0_i32_0 = arith.constant 0 : i32
    %c0_i32_1 = arith.constant 0 : i32
    return %c0_i32, %c0_i32_0 : i32, i32
  }
  func.func @transform_6(%arg0: i32) -> (i32, i32) {
    %c0_i32 = arith.constant 0 : i32
    %c0_i32_0 = arith.constant 0 : i32
    %c0_i32_1 = arith.constant 0 : i32
    return %c0_i32, %c0_i32_0 : i32, i32
  }
  func.func @transform_7(%arg0: i32) -> (i32, i32) {
    %c0_i32 = arith.constant 0 : i32
    %c0_i32_0 = arith.constant 0 : i32
    %c0_i32_1 = arith.constant 0 : i32
    return %c0_i32, %c0_i32_0 : i32, i32
  }
  func.func @transform_8(%arg0: i32) -> (i32, i32) {
    %c0_i32 = arith.constant 0 : i32
    %c0_i32_0 = arith.constant 0 : i32
    %c0_i32_1 = arith.constant 0 : i32
    return %c0_i32, %c0_i32_0 : i32, i32
  }
  func.func @transform_9(%arg0: i32) -> (i32, i32) {
    %c0_i32 = arith.constant 0 : i32
    %c0_i32_0 = arith.constant 0 : i32
    return %arg0, %c0_i32 : i32, i32
  }
}

</mosaic_0001>

<bundles_post_ra>
// kernel: tpu_custom_call.1
= control target key start
LH: loop header
LB: loop body
LE: loop exit
PB: predicated region body
PF: predicated region fallthrough
CT: control target
= control target key end

     0   :  { %s1032_s30 = smov 0   ;;  %s1229_s0 = inlined_call_operand.vmem [shape: f32[32,8,16], index: 0, kind: input, shape index: {}]   ;;  %s1230_s1 = inlined_call_operand.vmem [shape: f32[16,32], index: 1, kind: input, shape index: {}]   ;;  %s1231_s2 = inlined_call_operand.vmem [shape: f32[1,32], index: 2, kind: input, shape index: {}]   ;;  %s1232_s3 = inlined_call_operand.vmem [shape: f32[32,32], index: 3, kind: input, shape index: {}]   ;;  %s1233_s4 = inlined_call_operand.vmem [shape: f32[1,32], index: 4, kind: input, shape index: {}]   ;;  %s1234_s5 = inlined_call_operand.vmem [shape: f32[32,32], index: 5, kind: input, shape index: {}]   ;;  %s1235_s6 = inlined_call_operand.vmem [shape: f32[1,32], index: 6, kind: input, shape index: {}]   ;;  %s1236_s7 = inlined_call_operand.vmem [shape: f32[32,16], index: 7, kind: input, shape index: {}]   ;;  %s1237_s8 = inlined_call_operand.vmem [shape: f32[1,16], index: 8, kind: input, shape index: {}]   ;;  %s1238_s9 = inlined_call_operand.vmem [shape: f32[32,16], index: 9, kind: output, shape index: {}]  }
   0x1 LB: > { %s909_s10 = sadd.s32 4294967295, %s980_s30   ;;  %p913_p0 = scmp.ge.s32.totalorder %s980_s30, 1  ;;  %s980_s30 = sphi %s1032_s30, %s19_s30  }
   0x2   : > { %p288_p1 = scmp.lt.s32.totalorder %s980_s30, 3 }
   0x4   : > { %p289_p2 = pnand %p913_p0, %p288_p1 }
   0x5   : > { %s914_s15 = sshll.u32 (!%p289_p2), %s909_s10, 4  ;;  %s916_s12 = sshll.u32 (!%p289_p2), %s909_s10, 1 }
   0x6   : > { %292 = sbr.rel (%p289_p2) target bundleno = 688 (0x2b0), region = 56  ;;  %p325_p3 = scmp.lt.s32.totalorder (!%p289_p2), %s914_s15, 31 }
   0x7   : > { %p331_p4 = scmp.lt.s32.totalorder (!%p289_p2), %s916_s12, 3 }
   0xb   : > { %v353_v0 = vld [vmem:[%s1230_s1 + $0x8] sm:$0xff]  ;;  %v352_v1 = vld [vmem:[%s1230_s1] sm:$0xff]  ;;  %s1240_s15 = smov (!%p325_p3, %s914_s15), 31  ;;  %vm358_vm0 = vcmask 130048   ;;  %v491_v11 = vld [vmem:[%s1232_s3 + $0x18] sm:$0xff]  ;;  %vm496_vm1 = vcmask 261120  }
   0xc   : > { %421 = vmatpush.msra.mxu0 %v353_v0  ;;  %956 = vmatpush.msra.mxu3 %v353_v0  ;;  %s915_s16 = sshll.u32 %s1240_s15, 3  ;;  %v490_v19 = vld [vmem:[%s1232_s3 + $0x10] sm:$0xff]  ;;  %v489_v20 = vld [vmem:[%s1232_s3 + $0x8] sm:$0xff]  ;;  %v488_v21 = vld [vmem:[%s1232_s3] sm:$0xff]  ;;  %vm762_vm2 = vcmask 1041409   ;;  %vm764_vm3 = vcmask 1042434  }
   0xd   : > { %s1051_s19 = scalar_lea.vmem %s1229_s0, %s915_s16  ;;  %557 = vmatpush.msra.mxu1 %v491_v11  ;;  %958 = vmatpush.msra.mxu2 %v491_v11  ;;  %v1100_v22 = vld [vmem:[%s1231_s2] ss:$0 sm:$0xff]  ;;  %vm766_vm4 = vcmask 1043459   ;;  %vm768_vm5 = vcmask 1044484   ;;  %vm770_vm6 = vcmask 1045509   ;;  %vm772_vm7 = vcmask 1046534  }
   0xe   : > { %422 = vmatpush.msra.mxu0 %v352_v1  ;;  %957 = vmatpush.msra.mxu3 %v352_v1  ;;  %v336_v2 = vld [vmem:[%s1051_s19] sm:$0xff]  ;;  %v337_v3 = vld [vmem:[%s1051_s19 + $0x8] sm:$0xff]  ;;  %v338_v4 = vld [vmem:[%s1051_s19 + $0x10] sm:$0xff]  ;;  %vm774_vm8 = vcmask 1047559   ;;  %s1242_s12 = smov (!%p331_p4, %s916_s12), 3 }
   0xf   : > { %918 = vmatmul.msk.f32.vlgmr.msra.gmra.mxu0 %vm358_vm0, %v336_v2  ;;  %v339_v5 = vld [vmem:[%s1051_s19 + $0x18] sm:$0xff]  ;;  %v340_v6 = vld [vmem:[%s1051_s19 + $0x20] sm:$0xff]  ;;  %v341_v7 = vld [vmem:[%s1051_s19 + $0x28] sm:$0xff]  ;;  %558 = vmatpush.msra.mxu1 %v490_v19  ;;  %s917_s15 = sshll.u32 %s1242_s12, 3 }
  0x10   : > { %v346_v8 = vld [vmem:[%s1051_s19 + $0x50] sm:$0xff]  ;;  %v347_v10 = vld [vmem:[%s1051_s19 + $0x58] sm:$0xff]  ;;  %v348_v13 = vld [vmem:[%s1051_s19 + $0x60] sm:$0xff]  ;;  %959 = vmatpush.msra.mxu2 %v490_v19  ;;  %s334_s18 = scalar_lea.vmem %s1238_s9, %s917_s15 }
  0x11   : > { %928 = vmatmul.msk.f32.vlgmr.msra.gmra.mxu3 %vm358_vm0, %v346_v8  ;;  %v342_v9 = vld [vmem:[%s1051_s19 + $0x30] sm:$0xff]  ;;  %v343_v12 = vld [vmem:[%s1051_s19 + $0x38] sm:$0xff]  ;;  %v344_v14 = vld [vmem:[%s1051_s19 + $0x40] sm:$0xff]  ;;  %559 = vmatpush.msra.mxu1 %v489_v20 }
  0x12   : > { %v349_v15 = vld [vmem:[%s1051_s19 + $0x68] sm:$0xff]  ;;  %v350_v17 = vld [vmem:[%s1051_s19 + $0x70] sm:$0xff]  ;;  %v351_v18 = vld [vmem:[%s1051_s19 + $0x78] sm:$0xff]  ;;  %960 = vmatpush.msra.mxu2 %v489_v20 }
  0x13   : > { %v345_v16 = vld [vmem:[%s1051_s19 + $0x48] sm:$0xff]  ;;  %560 = vmatpush.msra.mxu1 %v488_v21  ;;  %v1137_v11 = vld [vmem:[%s1233_s4] ss:$0 sm:$0xff]  ;;  %v740_v20 = vld [vmem:[%s1234_s5 + $0x10] sm:$0xff] }
  0x14   : > { %961 = vmatpush.msra.mxu2 %v488_v21 }
  0x17   : > { %919 = vmatmul.msk.f32.gmra.mxu0 %vm358_vm0, %v337_v3 }
  0x19   : > { %929 = vmatmul.msk.f32.gmra.mxu3 %vm358_vm0, %v347_v10 }
  0x1f   : > { %920 = vmatmul.msk.f32.gmra.mxu0 %vm358_vm0, %v338_v4 }
  0x21   : > { %930 = vmatmul.msk.f32.gmra.mxu3 %vm358_vm0, %v348_v13 }
  0x27   : > { %921 = vmatmul.msk.f32.gmra.mxu0 %vm358_vm0, %v339_v5 }
  0x29   : > { %931 = vmatmul.msk.f32.gmra.mxu3 %vm358_vm0, %v349_v15 }
  0x2f   : > { %922 = vmatmul.msk.f32.gmra.mxu0 %vm358_vm0, %v340_v6 }
  0x31   : > { %932 = vmatmul.msk.f32.gmra.mxu3 %vm358_vm0, %v350_v17  ;;  %v741_v17 = vld [vmem:[%s1234_s5 + $0x18] sm:$0xff] }
  0x32   : > { %799 = vmatpush.msrb.mxu2 %v741_v17 }
  0x34   : > { %800 = vmatpush.msrb.mxu2 %v740_v20 }
  0x37   : > { %923 = vmatmul.msk.f32.gmra.mxu0 %vm358_vm0, %v341_v7 }
  0x39   : > { %933 = vmatmul.msk.f32.gmra.mxu3 %vm358_vm0, %v351_v18 }
  0x3f   : > { %924 = vmatmul.msk.f32.gmra.mxu0 %vm358_vm0, %v342_v9 }
  0x47   : > { %925 = vmatmul.msk.f32.gmra.mxu0 %vm358_vm0, %v343_v12 }
  0x4f   : > { %926 = vmatmul.msk.f32.gmra.mxu0 %vm358_vm0, %v344_v14 }
  0x57   : > { %927 = vmatmul.msk.f32.gmra.mxu0 %vm358_vm0, %v345_v16 }
  0x8c   : > { %v424_v23 = vpop.f32.mrf.mxu0 }
  0x8d   : > { %v425_v24 = vadd.f32 %v1100_v22, %v424_v23 }
  0x8f   : > { %v472_v25 = vmax.f32 %v425_v24, 0.0  ;;  %v739_v24 = vld [vmem:[%s1234_s5 + $0x8] sm:$0xff] }
  0x90   : > { %801 = vmatpush.msrb.mxu2 %v739_v24 }
  0x91   : > { %934 = vmatmul.msk.f32.vlgmr.msra.gmra.mxu1 %vm496_vm1, %v472_v25 }
  0x94   : > { %v427_v26 = vpop.f32.mrf.mxu0  ;;  %v454_v48 = vpop.f32.mrf.mxu3 }
  0x95   : > { %v428_v27 = vadd.f32 %v1100_v22, %v427_v26  ;;  %v455_v55 = vadd.f32 %v1100_v22, %v454_v48 }
  0x97   : > { %v473_v28 = vmax.f32 %v428_v27, 0.0  ;;  %v482_v56 = vmax.f32 %v455_v55, 0.0 }
  0x99   : > { %935 = vmatmul.msk.f32.gmra.mxu1 %vm496_vm1, %v473_v28 }
  0x9c   : > { %v430_v29 = vpop.f32.mrf.mxu0  ;;  %v457_v53 = vpop.f32.mrf.mxu3 }
  0x9d   : > { %v431_v30 = vadd.f32 %v1100_v22, %v430_v29  ;;  %v458_v58 = vadd.f32 %v1100_v22, %v457_v53  ;;  %v738_v29 = vld [vmem:[%s1234_s5] sm:$0xff] }
  0x9e   : > { %802 = vmatpush.msrb.mxu2 %v738_v29 }
  0x9f   : > { %v474_v31 = vmax.f32 %v431_v30, 0.0  ;;  %v483_v59 = vmax.f32 %v458_v58, 0.0 }
  0xa1   : > { %936 = vmatmul.msk.f32.gmra.mxu1 %vm496_vm1, %v474_v31 }
  0xa4   : > { %v433_v32 = vpop.f32.mrf.mxu0  ;;  %v460_v57 = vpop.f32.mrf.mxu3 }
  0xa5   : > { %v434_v33 = vadd.f32 %v1100_v22, %v433_v32  ;;  %v461_v60 = vadd.f32 %v1100_v22, %v460_v57 }
  0xa7   : > { %v475_v34 = vmax.f32 %v434_v33, 0.0  ;;  %v484_v62 = vmax.f32 %v461_v60, 0.0 }
  0xa9   : > { %937 = vmatmul.msk.f32.gmra.mxu1 %vm496_vm1, %v475_v34 }
  0xac   : > { %v436_v35 = vpop.f32.mrf.mxu0  ;;  %v463_v61 = vpop.f32.mrf.mxu3 }
  0xad   : > { %v437_v36 = vadd.f32 %v1100_v22, %v436_v35  ;;  %v464_v63 = vadd.f32 %v1100_v22, %v463_v61 }
  0xaf   : > { %v476_v37 = vmax.f32 %v437_v36, 0.0  ;;  %v485_v1 = vmax.f32 %v464_v63, 0.0 }
  0xb1   : > { %938 = vmatmul.msk.f32.gmra.mxu1 %vm496_vm1, %v476_v37 }
  0xb4   : > { %v439_v38 = vpop.f32.mrf.mxu0  ;;  %v466_v0 = vpop.f32.mrf.mxu3 }
  0xb5   : > { %v440_v39 = vadd.f32 %v1100_v22, %v439_v38  ;;  %v467_v2 = vadd.f32 %v1100_v22, %v466_v0 }
  0xb7   : > { %v477_v40 = vmax.f32 %v440_v39, 0.0  ;;  %v486_v3 = vmax.f32 %v467_v2, 0.0 }
  0xb9   : > { %939 = vmatmul.msk.f32.gmra.mxu1 %vm496_vm1, %v477_v40 }
  0xbc   : > { %v442_v41 = vpop.f32.mrf.mxu0  ;;  %v469_v4 = vpop.f32.mrf.mxu3 }
  0xbd   : > { %v443_v42 = vadd.f32 %v1100_v22, %v442_v41  ;;  %v470_v5 = vadd.f32 %v1100_v22, %v469_v4 }
  0xbf   : > { %v478_v43 = vmax.f32 %v443_v42, 0.0  ;;  %v487_v6 = vmax.f32 %v470_v5, 0.0 }
  0xc1   : > { %940 = vmatmul.msk.f32.gmra.mxu1 %vm496_vm1, %v478_v43 }
  0xc4   : > { %v445_v44 = vpop.f32.mrf.mxu0 }
  0xc5   : > { %v446_v45 = vadd.f32 %v1100_v22, %v445_v44 }
  0xc7   : > { %v479_v46 = vmax.f32 %v446_v45, 0.0 }
  0xc9   : > { %941 = vmatmul.msk.f32.gmra.mxu1 %vm496_vm1, %v479_v46 }
  0xcc   : > { %v448_v47 = vpop.f32.mrf.mxu0 }
  0xcd   : > { %v449_v49 = vadd.f32 %v1100_v22, %v448_v47 }
  0xcf   : > { %v480_v50 = vmax.f32 %v449_v49, 0.0 }
  0xd1   : > { %942 = vmatmul.msk.f32.gmra.mxu1 %vm496_vm1, %v480_v50 }
  0xd4   : > { %v451_v51 = vpop.f32.mrf.mxu0 }
  0xd5   : > { %v452_v52 = vadd.f32 %v1100_v22, %v451_v51 }
  0xd7   : > { %v481_v54 = vmax.f32 %v452_v52, 0.0 }
  0xd9   : > { %943 = vmatmul.msk.f32.vlgmr.msra.gmra.mxu2 %vm496_vm1, %v481_v54 }
  0xe1   : > { %944 = vmatmul.msk.f32.gmra.mxu2 %vm496_vm1, %v482_v56 }
  0xe9   : > { %945 = vmatmul.msk.f32.gmra.mxu2 %vm496_vm1, %v483_v59 }
  0xf1   : > { %946 = vmatmul.msk.f32.gmra.mxu2 %vm496_vm1, %v484_v62 }
  0xf9   : > { %947 = vmatmul.msk.f32.gmra.mxu2 %vm496_vm1, %v485_v1 }
 0x101   : > { %948 = vmatmul.msk.f32.gmra.mxu2 %vm496_vm1, %v486_v3 }
 0x109   : > { %949 = vmatmul.msk.f32.gmra.mxu2 %vm496_vm1, %v487_v6 }
 0x10e   : > { %v562_v7 = vpop.f32.mrf.mxu1 }
 0x10f   : > { %v563_v15 = vadd.f32 %v1137_v11, %v562_v7 }
 0x111   : > { %v610_v22 = vmax.f32 %v563_v15, 0.0 }
 0x113   : > { %v626_v31 = vsel %vm496_vm1, %v610_v22, 0.0 }
 0x114   : > { %v627_v38 = vrot.slane %v626_v31, 4 }
 0x116   : > { %v565_v8 = vpop.f32.mrf.mxu1  ;;  %v628_v46 = vadd.f32 %v627_v38, %v626_v31 }
 0x117   : > { %v566_v13 = vadd.f32 %v1137_v11, %v565_v8 }
 0x118   : > { %v629_v54 = vrot.slane %v628_v46, 2 }
 0x119   : > { %v611_v19 = vmax.f32 %v566_v13, 0.0 }
 0x11a   : > { %v630_v0 = vadd.f32 %v629_v54, %v628_v46 }
 0x11b   : > { %v633_v27 = vsel %vm496_vm1, %v611_v19, 0.0 }
 0x11c   : > { %v634_v34 = vrot.slane %v633_v27, 4 }
 0x11e   : > { %v568_v9 = vpop.f32.mrf.mxu1  ;;  %v635_v41 = vadd.f32 %v634_v34, %v633_v27 }
 0x11f   : > { %v569_v14 = vadd.f32 %v1137_v11, %v568_v9 }
 0x120   : > { %v636_v50 = vrot.slane %v635_v41, 2 }
 0x121   : > { %v612_v21 = vmax.f32 %v569_v14, 0.0 }
 0x122   : > { %v637_v58 = vadd.f32 %v636_v50, %v635_v41 }
 0x123   : > { %v640_v30 = vsel %vm496_vm1, %v612_v21, 0.0 }
 0x124   : > { %v641_v36 = vrot.slane %v640_v30, 4  ;;  %v638_v5 = vrot.slane %v637_v58, 1 }
 0x126   : > { %v571_v10 = vpop.f32.mrf.mxu1  ;;  %v642_v44 = vadd.f32 %v641_v36, %v640_v30  ;;  %v639_v15 = vadd.f32 %v638_v5, %v637_v58  ;;  %v815_v58 = vld [vmem:[%s1236_s7 + $0x18] sm:$0xff] }
 0x127   : > { %v572_v16 = vadd.f32 %v1137_v11, %v571_v10  ;;  %v631_v10 = vrot.slane %v630_v0, 1  ;;  %838 = vmatpush.msrb.mxu3 %v815_v58 }
 0x128   : > { %v643_v52 = vrot.slane %v642_v44, 2 }
 0x129   : > { %v613_v23 = vmax.f32 %v572_v16, 0.0  ;;  %v632_v20 = vadd.f32 %v631_v10, %v630_v0 }
 0x12a   : > { %v644_v62 = vadd.f32 %v643_v52, %v642_v44 }
 0x12b   : > { %v647_v32 = vsel %vm496_vm1, %v613_v23, 0.0  ;;  %v763_v24 = vsel %vm762_vm2, %v639_v15, %v632_v20 }
 0x12c   : > { %v648_v39 = vrot.slane %v647_v32, 4  ;;  %v645_v7 = vrot.slane %v644_v62, 1 }
 0x12e   : > { %v574_v12 = vpop.f32.mrf.mxu1  ;;  %v649_v47 = vadd.f32 %v648_v39, %v647_v32 }
 0x12f   : > { %v575_v18 = vadd.f32 %v1137_v11, %v574_v12 }
 0x130   : > { %v650_v55 = vrot.slane %v649_v47, 2 }
 0x131   : > { %v614_v25 = vmax.f32 %v575_v18, 0.0  ;;  %v646_v18 = vadd.f32 %v645_v7, %v644_v62 }
 0x132   : > { %v651_v1 = vadd.f32 %v650_v55, %v649_v47 }
 0x133   : > { %v654_v35 = vsel %vm496_vm1, %v614_v25, 0.0  ;;  %v765_v27 = vsel %vm764_vm3, %v646_v18, %v763_v24 }
 0x134   : > { %v655_v40 = vrot.slane %v654_v35, 4  ;;  %v652_v12 = vrot.slane %v651_v1, 1 }
 0x136   : > { %v577_v26 = vpop.f32.mrf.mxu1  ;;  %v656_v48 = vadd.f32 %v655_v40, %v654_v35  ;;  %v653_v21 = vadd.f32 %v652_v12, %v651_v1 }
 0x137   : > { %v578_v28 = vadd.f32 %v1137_v11, %v577_v26 }
 0x138   : > { %v657_v57 = vrot.slane %v656_v48, 2  ;;  %v767_v30 = vsel %vm766_vm4, %v653_v21, %v765_v27 }
 0x139   : > { %v615_v33 = vmax.f32 %v578_v28, 0.0 }
 0x13a   : > { %v658_v3 = vadd.f32 %v657_v57, %v656_v48 }
 0x13b   : > { %v661_v37 = vsel %vm496_vm1, %v615_v33, 0.0 }
 0x13c   : > { %v662_v42 = vrot.slane %v661_v37, 4  ;;  %v659_v14 = vrot.slane %v658_v3, 1 }
 0x13e   : > { %v580_v43 = vpop.f32.mrf.mxu1  ;;  %v663_v51 = vadd.f32 %v662_v42, %v661_v37  ;;  %v660_v23 = vadd.f32 %v659_v14, %v658_v3 }
 0x13f   : > { %v581_v45 = vadd.f32 %v1137_v11, %v580_v43 }
 0x140   : > { %v664_v59 = vrot.slane %v663_v51, 2  ;;  %v769_v31 = vsel %vm768_vm5, %v660_v23, %v767_v30 }
 0x141   : > { %v616_v49 = vmax.f32 %v581_v45, 0.0 }
 0x142   : > { %v665_v6 = vadd.f32 %v664_v59, %v663_v51 }
 0x143   : > { %v668_v53 = vsel %vm496_vm1, %v616_v49, 0.0 }
 0x144   : > { %v669_v56 = vrot.slane %v668_v53, 4  ;;  %v666_v16 = vrot.slane %v665_v6, 1 }
 0x146   : > { %v670_v60 = vadd.f32 %v669_v56, %v668_v53  ;;  %v583_v61 = vpop.f32.mrf.mxu1  ;;  %v667_v25 = vadd.f32 %v666_v16, %v665_v6 }
 0x147   : > { %v584_v63 = vadd.f32 %v1137_v11, %v583_v61 }
 0x148   : > { %v671_v2 = vrot.slane %v670_v60, 2  ;;  %v771_v33 = vsel %vm770_vm6, %v667_v25, %v769_v31 }
 0x149   : > { %v617_v4 = vmax.f32 %v584_v63, 0.0 }
 0x14a   : > { %v672_v8 = vadd.f32 %v671_v2, %v670_v60 }
 0x14b   : > { %v675_v9 = vsel %vm496_vm1, %v617_v4, 0.0 }
 0x14c   : > { %v676_v13 = vrot.slane %v675_v9, 4  ;;  %v673_v19 = vrot.slane %v672_v8, 1 }
 0x14e   : > { %v677_v17 = vadd.f32 %v676_v13, %v675_v9  ;;  %v674_v28 = vadd.f32 %v673_v19, %v672_v8  ;;  %v586_v39 = vpop.f32.mrf.mxu1 }
 0x14f   : > { %v587_v43 = vadd.f32 %v1137_v11, %v586_v39 }
 0x150   : > { %v678_v22 = vrot.slane %v677_v17, 2  ;;  %v773_v34 = vsel %vm772_vm7, %v674_v28, %v771_v33 }
 0x151   : > { %v618_v48 = vmax.f32 %v587_v43, 0.0 }
 0x152   : > { %v679_v26 = vadd.f32 %v678_v22, %v677_v17 }
 0x153   : > { %v682_v55 = vsel %vm496_vm1, %v618_v48, 0.0 }
 0x154   : > { %v680_v29 = vrot.slane %v679_v26, 1  ;;  %v683_v63 = vrot.slane %v682_v55, 4 }
 0x156   : > { %v681_v32 = vadd.f32 %v680_v29, %v679_v26  ;;  %v684_v7 = vadd.f32 %v683_v63, %v682_v55  ;;  %v972_v63 = vld [vmem:[%s1235_s6] ss:$0 sm:$0xff] }
 0x158   : > { %v775_v35 = vsel %vm774_vm8, %v681_v32, %v773_v34  ;;  %v685_v16 = vrot.slane %v684_v7, 2 }
 0x159   : > { %950 = vmatmul.msk.f32.vlgmr.msrb.gmra.mxu2 %vm496_vm1, %v775_v35 }
 0x15a   : > { %v686_v26 = vadd.f32 %v685_v16, %v684_v7 }
 0x15c   : > { %v589_v36 = vpop.f32.mrf.mxu2 }
 0x15d   : > { %v590_v41 = vadd.f32 %v1137_v11, %v589_v36  ;;  %v687_v36 = vrot.slane %v686_v26, 1 }
 0x15f   : > { %v619_v46 = vmax.f32 %v590_v41, 0.0 }
 0x161   : > { %v689_v52 = vsel %vm496_vm1, %v619_v46, 0.0 }
 0x162   : > { %v690_v59 = vrot.slane %v689_v52, 4 }
 0x164   : > { %v592_v37 = vpop.f32.mrf.mxu2  ;;  %v691_v2 = vadd.f32 %v690_v59, %v689_v52 }
 0x165   : > { %v593_v42 = vadd.f32 %v1137_v11, %v592_v37 }
 0x166   : > { %v692_v12 = vrot.slane %v691_v2, 2 }
 0x167   : > { %v620_v47 = vmax.f32 %v593_v42, 0.0 }
 0x168   : > { %v693_v20 = vadd.f32 %v692_v12, %v691_v2 }
 0x169   : > { %v696_v54 = vsel %vm496_vm1, %v620_v47, 0.0 }
 0x16a   : > { %v697_v61 = vrot.slane %v696_v54, 4  ;;  %v694_v31 = vrot.slane %v693_v20, 1 }
 0x16c   : > { %v595_v38 = vpop.f32.mrf.mxu2  ;;  %v698_v5 = vadd.f32 %v697_v61, %v696_v54  ;;  %v813_v61 = vld [vmem:[%s1236_s7 + $0x8] sm:$0xff] }
 0x16d   : > { %v596_v44 = vadd.f32 %v1137_v11, %v595_v38 }
 0x16e   : > { %v699_v14 = vrot.slane %v698_v5, 2 }
 0x16f   : > { %v621_v49 = vmax.f32 %v596_v44, 0.0  ;;  %v688_v44 = vadd.f32 %v687_v36, %v686_v26 }
 0x170   : > { %v700_v24 = vadd.f32 %v699_v14, %v698_v5 }
 0x171   : > { %v703_v56 = vsel %vm496_vm1, %v621_v49, 0.0 }
 0x172   : > { %v704_v0 = vrot.slane %v703_v56, 4  ;;  %v701_v33 = vrot.slane %v700_v24, 1 }
 0x174   : > { %v598_v40 = vpop.f32.mrf.mxu2  ;;  %v705_v8 = vadd.f32 %v704_v0, %v703_v56  ;;  %v702_v43 = vadd.f32 %v701_v33, %v700_v24 }
 0x175   : > { %v599_v45 = vadd.f32 %v1137_v11, %v598_v40  ;;  %v695_v40 = vadd.f32 %v694_v31, %v693_v20 }
 0x176   : > { %v706_v17 = vrot.slane %v705_v8, 2 }
 0x177   : > { %v622_v50 = vmax.f32 %v599_v45, 0.0  ;;  %v776_v48 = vsel %vm762_vm2, %v695_v40, %v688_v44 }
 0x178   : > { %v707_v27 = vadd.f32 %v706_v17, %v705_v8 }
 0x179   : > { %v710_v60 = vsel %vm496_vm1, %v622_v50, 0.0 }
 0x17a   : > { %v711_v1 = vrot.slane %v710_v60, 4  ;;  %v708_v37 = vrot.slane %v707_v27, 1 }
 0x17c   : > { %v601_v51 = vpop.f32.mrf.mxu2  ;;  %v712_v9 = vadd.f32 %v711_v1, %v710_v60  ;;  %v709_v45 = vadd.f32 %v708_v37, %v707_v27  ;;  %v814_v60 = vld [vmem:[%s1236_s7 + $0x10] sm:$0xff] }
 0x17d   : > { %v602_v53 = vadd.f32 %v1137_v11, %v601_v51  ;;  %v777_v51 = vsel %vm764_vm3, %v702_v43, %v776_v48  ;;  %839 = vmatpush.msrb.mxu3 %v814_v60 }
 0x17e   : > { %v713_v19 = vrot.slane %v712_v9, 2  ;;  %v778_v54 = vsel %vm766_vm4, %v709_v45, %v777_v51 }
 0x17f   : > { %v623_v57 = vmax.f32 %v602_v53, 0.0  ;;  %840 = vmatpush.msrb.mxu3 %v813_v61 }
 0x180   : > { %v714_v29 = vadd.f32 %v713_v19, %v712_v9 }
 0x181   : > { %v717_v62 = vsel %vm496_vm1, %v623_v57, 0.0 }
 0x182   : > { %v718_v3 = vrot.slane %v717_v62, 4  ;;  %v715_v39 = vrot.slane %v714_v29, 1 }
 0x184   : > { %v604_v4 = vpop.f32.mrf.mxu2  ;;  %v719_v13 = vadd.f32 %v718_v3, %v717_v62  ;;  %v716_v47 = vadd.f32 %v715_v39, %v714_v29  ;;  %v812_v62 = vld [vmem:[%s1236_s7] sm:$0xff] }
 0x185   : > { %v605_v6 = vadd.f32 %v1137_v11, %v604_v4  ;;  %841 = vmatpush.msrb.mxu3 %v812_v62 }
 0x186   : > { %v720_v21 = vrot.slane %v719_v13, 2  ;;  %v779_v55 = vsel %vm768_vm5, %v716_v47, %v778_v54 }
 0x187   : > { %v624_v10 = vmax.f32 %v605_v6, 0.0  ;;  %v973_v6 = vld [vmem:[%s1237_s8] ss:$0 sm:$0xff] }
 0x188   : > { %v721_v32 = vadd.f32 %v720_v21, %v719_v13 }
 0x189   : > { %v724_v15 = vsel %vm496_vm1, %v624_v10, 0.0 }
 0x18a   : > { %v725_v18 = vrot.slane %v724_v15, 4  ;;  %v722_v41 = vrot.slane %v721_v32, 1 }
 0x18c   : > { %v726_v22 = vadd.f32 %v725_v18, %v724_v15  ;;  %v607_v23 = vpop.f32.mrf.mxu2  ;;  %v723_v49 = vadd.f32 %v722_v41, %v721_v32 }
 0x18d   : > { %v608_v25 = vadd.f32 %v1137_v11, %v607_v23 }
 0x18e   : > { %v727_v28 = vrot.slane %v726_v22, 2  ;;  %v780_v57 = vsel %vm770_vm6, %v723_v49, %v779_v55 }
 0x18f   : > { %v625_v30 = vmax.f32 %v608_v25, 0.0 }
 0x190   : > { %v728_v34 = vadd.f32 %v727_v28, %v726_v22 }
 0x191   : > { %v731_v35 = vsel %vm496_vm1, %v625_v30, 0.0 }
 0x192   : > { %v732_v38 = vrot.slane %v731_v35, 4  ;;  %v729_v11 = vrot.slane %v728_v34, 1 }
 0x194   : > { %v733_v42 = vadd.f32 %v732_v38, %v731_v35  ;;  %v730_v52 = vadd.f32 %v729_v11, %v728_v34 }
 0x196   : > { %v734_v46 = vrot.slane %v733_v42, 2  ;;  %v781_v58 = vsel %vm772_vm7, %v730_v52, %v780_v57 }
 0x198   : > { %v735_v50 = vadd.f32 %v734_v46, %v733_v42 }
 0x19a   : > { %v736_v53 = vrot.slane %v735_v50, 1 }
 0x19c   : > { %v737_v56 = vadd.f32 %v736_v53, %v735_v50 }
 0x19e   : > { %v782_v59 = vsel %vm774_vm8, %v737_v56, %v781_v58 }
 0x19f   : > { %951 = vmatmul.msk.f32.gmra.mxu2 %vm496_vm1, %v782_v59 }
 0x1dc   : > { %v804_v0 = vpop.f32.mrf.mxu2 }
 0x1dd   : > { %v805_v1 = vadd.f32 %v972_v63, %v804_v0 }
 0x1df   : > { %v810_v2 = vmax.f32 %v805_v1, 0.0 }
 0x1e1   : > { %952 = vmatmul.msk.f32.vlgmr.msrb.gmra.mxu3 %vm496_vm1, %v810_v2 }
 0x222   : > { %v807_v3 = vpop.f32.mrf.mxu2 }
 0x223   : > { %v808_v4 = vadd.f32 %v972_v63, %v807_v3 }
 0x225   : > { %v811_v5 = vmax.f32 %v808_v4, 0.0 }
 0x227   : > { %953 = vmatmul.msk.f32.gmra.mxu3 %vm496_vm1, %v811_v5 }
 0x264   : > { %v843_v7 = vpop.f32.mrf.mxu3 }
 0x265   : > { %v844_v8 = vadd.f32 %v973_v6, %v843_v7 }
 0x267   : > { %v849_v9 = vmax.f32 %v844_v8, 0.0 }
 0x269   : > { %851 = vst.msk [vmem:[%s334_s18] sm:$0xff] %vm358_vm0, %v849_v9 }
 0x2aa   : > { %v846_v10 = vpop.f32.mrf.mxu3 }
 0x2ab   : > { %v847_v12 = vadd.f32 %v973_v6, %v846_v10 }
 0x2ad   : > { %v850_v13 = vmax.f32 %v847_v12, 0.0 }
 0x2af   : > { %852 = vst.msk [vmem:[%s334_s18 + $0x8] sm:$0xff] %vm358_vm0, %v850_v13 }
 0x2b0 PF: > { %s19_s30 = sadd.s32 1, %s980_s30  }
 0x2b1   : > { %p16_p5 = scmp.ge.s32.totalorder %s19_s30, 4  }
 0x2b3   :  { %18 = sbr.rel (!%p16_p5) target bundleno = 1 (0x1), region = 86 }

</bundles_post_ra>
